<compile_context>
chip_gen: v6e
topology: v6e:2x2x1
jax: 0.10.0
libtpu: 0.0.40
codegen_flags: <defaults>
</compile_context>

<pallas_src>
import functools

import jax
import jax.numpy as jnp
from jax.experimental import pallas as pl
from jax.experimental.pallas import tpu as pltpu


def _round_up(n, m):
    return ((n + m - 1) // m) * m


def _char_gen_rnn_kernel(x_ref, h0_ref, wih_ref, whh_ref, bih_ref, wo_ref, bo_ref,
                         y_ref, hn_ref, xp_ref, h_ref, *, seq_len, t_sub):
    """One grid step == (one batch block) x (one chunk of t_chunk timesteps).

    Stage 1 (batched): xp[t] = x[t] @ W_ih^T + (b_ih + b_hh)       -> xp_ref
    Stage 2 (serial) : h[t]  = tanh(xp[t] + h[t-1] @ W_hh^T)       -> h_ref
    Stage 3 (batched): y[t]  = log_softmax(h[t] @ W_o^T + b_o)     -> y_ref
    """
    t_chunk, b_blk, a_in = x_ref.shape
    hp = whh_ref.shape[0]                 # padded hidden (multiple of 128)
    a_out = wo_ref.shape[1]               # real alphabet size (un-padded output)
    rows = t_sub * b_blk                  # rows per batched MXU matmul (~256)

    c = pl.program_id(1)                  # time-chunk index (axis 0 = batch block)

    # Initialize the cross-chunk hidden carry (hn_ref is a resident output block
    # along the 'arbitrary' chunk axis).
    @pl.when(c == 0)
    def _():
        hn_ref[...] = h0_ref[...]

    # ---- Stage 1: input projection for the whole chunk (hoisted out of the
    #      serial loop), in ~256-row sub-tiles.  Loads/broadcasts hoisted. ----
    wih = wih_ref[...]                                     # (a_in, hp)
    bih_b = jnp.broadcast_to(bih_ref[...], (rows, hp))     # hoisted broadcast
    for r0 in range(0, t_chunk, t_sub):
        xs = x_ref[r0:r0 + t_sub].reshape(rows, a_in).astype(wih.dtype)
        xp = jnp.dot(xs, wih, preferred_element_type=jnp.float32) + bih_b
        xp_ref[r0:r0 + t_sub] = xp.reshape(t_sub, b_blk, hp)

    # ---- Stage 2: tanh recurrence — the only serial part; unmasked. ----
    # W_hh is loaded once and stays resident across the whole chain.
    whh = whh_ref[...]                                     # (hp, hp) f32

    def step(t, h_prev):
        pre = xp_ref[t] + jnp.dot(h_prev, whh, preferred_element_type=jnp.float32)
        h_new = jnp.tanh(pre)
        h_ref[t] = h_new                  # separate buffer -> no alias with xp loads
        return h_new

    jax.lax.fori_loop(0, t_chunk, step, hn_ref[...], unroll=8)

    # Cross-chunk / final hidden carry: instead of masking every timestep, pick
    # the hidden state at the last REAL timestep of this chunk (padded timesteps
    # only exist in the tail of the final chunk; their y rows are sliced off).
    last_t = jnp.minimum(t_chunk - 1, seq_len - 1 - c * t_chunk)
    hn_ref[...] = h_ref[last_t]

    # ---- Stage 3: o2o projection + log_softmax over the REAL alphabet lanes ----
    wo = wo_ref[...]                                       # (hp, a_out)
    bo_b = jnp.broadcast_to(bo_ref[...], (rows, a_out))    # hoisted broadcast
    for r0 in range(0, t_chunk, t_sub):
        h_all = h_ref[r0:r0 + t_sub].reshape(rows, hp).astype(wo.dtype)
        logits = jnp.dot(h_all, wo, preferred_element_type=jnp.float32) + bo_b
        m = jnp.max(logits, axis=-1, keepdims=True)
        shifted = logits - m
        lse = jnp.log(jnp.sum(jnp.exp(shifted), axis=-1, keepdims=True))
        y_ref[r0:r0 + t_sub] = (shifted - lse).reshape(t_sub, b_blk, a_out).astype(y_ref.dtype)


@functools.partial(jax.jit, static_argnames=("use_bf16_mxu",))
def char_gen_rnn_forward(x_btA, params, h0=None, *, use_bf16_mxu=False):
    """x_btA: (B, T, A); h0: (1, B, H) or None.

    Returns (log_probs (B, T, A), hidden (1, B, H)), matching CharGenRNN.forward.
    use_bf16_mxu=True casts the NON-recurrent Stage-1/3 weights to bf16 (f32
    accumulation; the W_hh recurrence stays f32) — the v6e/v7x MXU path.
    """
    w_ih, w_hh, b_ih, b_hh, w_o, b_o = params
    B, T, A = x_btA.shape
    H = w_hh.shape[0]
    f32 = jnp.float32
    mxu_dtype = jnp.bfloat16 if use_bf16_mxu else f32

    # ---- padded / chunked geometry ----
    b_blk = 8                                    # sublane-aligned batch block
    B_pad = _round_up(B, b_blk)
    n_bb = B_pad // b_blk                        # 'parallel' batch-block axis (uses both v7x TCs when >1)
    H_pad = _round_up(H, 128)                    # lane-aligned hidden
    t_sub = max(8, (256 // b_blk) // 8 * 8)      # ~256 rows per batched matmul
    t_sub = min(t_sub, _round_up(T, 8))
    T_TARGET = 512                               # timesteps per grid step (amortize per-step overhead)
    n_chunks = max(1, -(-T // T_TARGET))
    t_chunk = _round_up(-(-T // n_chunks), t_sub)
    n_chunks = -(-T // t_chunk)                  # guarantees padding only in the FINAL chunk
    T_pad = n_chunks * t_chunk

    # Time-major, padded input (the permute fuses into the padding copy).
    x_tb = jnp.swapaxes(x_btA.astype(f32), 0, 1)                     # (T, B, A)
    x_p = jnp.pad(x_tb, ((0, T_pad - T), (0, B_pad - B), (0, 0)))    # (T_pad, B_pad, A)

    if h0 is None:
        h0_p = jnp.zeros((B_pad, H_pad), f32)
    else:
        h0_p = jnp.zeros((B_pad, H_pad), f32).at[:B, :H].set(h0.reshape(B, H).astype(f32))

    # Padded weights.  Padding is exact: padded H lanes stay identically 0
    # through the recurrence and hit zero rows of W_o; the output alphabet is
    # NOT padded, so log_softmax runs only on real lanes.
    wih_p = jnp.zeros((A, H_pad), f32).at[:, :H].set(w_ih.T.astype(f32)).astype(mxu_dtype)
    whh_p = jnp.zeros((H_pad, H_pad), f32).at[:H, :H].set(w_hh.T.astype(f32))   # recurrence stays f32
    bih_p = jnp.zeros((1, H_pad), f32).at[0, :H].set((b_ih + b_hh).astype(f32))
    wo_p = jnp.zeros((H_pad, A), f32).at[:H, :].set(w_o.T.astype(f32)).astype(mxu_dtype)
    bo_p = b_o.astype(f32).reshape(1, A)

    kernel = functools.partial(_char_gen_rnn_kernel, seq_len=T, t_sub=t_sub)

    y_p, hn_p = pl.pallas_call(
        kernel,
        out_shape=(
            jax.ShapeDtypeStruct((T_pad, B_pad, A), f32),
            jax.ShapeDtypeStruct((B_pad, H_pad), f32),
        ),
        grid_spec=pltpu.PrefetchScalarGridSpec(
            num_scalar_prefetch=0,
            grid=(n_bb, n_chunks),                  # (batch blocks, time chunks)
            in_specs=[
                pl.BlockSpec((t_chunk, b_blk, A), lambda b, c: (c, b, 0)),   # x chunk
                pl.BlockSpec((b_blk, H_pad), lambda b, c: (b, 0)),           # h0
                pl.BlockSpec((A, H_pad), lambda b, c: (0, 0)),               # W_ih^T
                pl.BlockSpec((H_pad, H_pad), lambda b, c: (0, 0)),           # W_hh^T
                pl.BlockSpec((1, H_pad), lambda b, c: (0, 0)),               # b_ih + b_hh
                pl.BlockSpec((H_pad, A), lambda b, c: (0, 0)),               # W_o^T
                pl.BlockSpec((1, A), lambda b, c: (0, 0)),                   # b_o
            ],
            out_specs=[
                pl.BlockSpec((t_chunk, b_blk, A), lambda b, c: (c, b, 0)),   # log-probs
                pl.BlockSpec((b_blk, H_pad), lambda b, c: (b, 0)),           # h carry / h_n
            ],
            scratch_shapes=[
                pltpu.VMEM((t_chunk, b_blk, H_pad), f32),   # xp: chunk-wide input projections
                pltpu.VMEM((t_chunk, b_blk, H_pad), f32),   # h : chunk-wide per-timestep hidden
            ],
        ),
        compiler_params=pltpu.CompilerParams(
            dimension_semantics=("parallel", "arbitrary")),   # batch parallel, time sequential
    )(x_p, h0_p, wih_p, whh_p, bih_p, wo_p, bo_p)

    # Slice padding off + permute back to batch_first (single fused XLA copy).
    log_probs = jnp.swapaxes(y_p[:T, :B, :], 0, 1)      # (B, T, A)
    hidden = hn_p[:B, :H].reshape(1, B, H)              # nn.RNN hidden shape (1, B, H)
    return log_probs, hidden


def init_params(key, alphabet_size, hidden_size):
    """Deterministic PyTorch-style uniform(-1/sqrt(H), 1/sqrt(H)) init."""
    ks = jax.random.split(key, 6)
    bound = 1.0 / jnp.sqrt(hidden_size)
    u = lambda k, shape: jax.random.uniform(k, shape, jnp.float32, -bound, bound)
    w_ih = u(ks[0], (hidden_size, alphabet_size))     # nn.RNN weight_ih_l0
    w_hh = u(ks[1], (hidden_size, hidden_size))       # nn.RNN weight_hh_l0
    b_ih = u(ks[2], (hidden_size,))
    b_hh = u(ks[3], (hidden_size,))
    w_o = u(ks[4], (alphabet_size, hidden_size))      # nn.Linear weight
    b_o = u(ks[5], (alphabet_size,))
    return (w_ih, w_hh, b_ih, b_hh, w_o, b_o)


def _reference_forward(x, params, h0=None, mxu_dtype=jnp.float32):
    """Pure-JAX reference (lax.scan).  mxu_dtype optionally mirrors the kernel's
    bf16 Stage-1/3 operand cast (f32 accumulation; recurrence stays f32)."""
    w_ih, w_hh, b_ih, b_hh, w_o, b_o = params
    B, T, A = x.shape
    H = w_hh.shape[0]
    h = jnp.zeros((B, H), jnp.float32) if h0 is None else h0.reshape(B, H).astype(jnp.float32)
    wih_t = w_ih.T.astype(mxu_dtype)
    wo_t = w_o.T.astype(mxu_dtype)

    def step(h, x_t):
        xp = jnp.dot(x_t.astype(mxu_dtype), wih_t,
                     preferred_element_type=jnp.float32) + b_ih + b_hh
        h_new = jnp.tanh(xp + h @ w_hh.T)
        return h_new, h_new

    h_n, hs = jax.lax.scan(step, h, jnp.transpose(x, (1, 0, 2)))
    rnn_out = jnp.transpose(hs, (1, 0, 2))            # (B, T, H)
    logits = jnp.dot(rnn_out.astype(mxu_dtype), wo_t,
                     preferred_element_type=jnp.float32) + b_o
    log_probs = jax.nn.log_softmax(logits, axis=-1)
    return log_probs, h_n.reshape(1, B, H)


if __name__ == "__main__":
    ALPHABET, HIDDEN = 32, 64
    key = jax.random.PRNGKey(0)
    k_p, k_x1, k_h1, k_x3, k_h3, k_x4, k_h4, k_x5, k_h5 = jax.random.split(key, 9)
    params = init_params(k_p, ALPHABET, HIDDEN)

    # 1) small batch-first input with explicit h0;  2) same input, h0=None
    x1 = jax.random.normal(k_x1, (2, 8, ALPHABET), jnp.float32)
    h01 = jax.random.normal(k_h1, (1, 2, HIDDEN), jnp.float32)
    # 3) B > 8 -> two batch blocks on the 'parallel' grid axis
    x3 = jax.random.normal(k_x3, (10, 40, ALPHABET), jnp.float32)
    h03 = jax.random.normal(k_h3, (1, 10, HIDDEN), jnp.float32)
    # 4) long / ragged T -> multiple time chunks, cross-chunk carry, tail padding
    x4 = jax.random.normal(k_x4, (3, 700, ALPHABET), jnp.float32)
    h04 = jax.random.normal(k_h4, (1, 3, HIDDEN), jnp.float32)

    for x, h0 in [(x1, h01), (x1, None), (x3, h03), (x4, h04)]:
        lp, hn = char_gen_rnn_forward(x, params, h0)
        jax.block_until_ready((lp, hn))
        ref_lp, ref_hn = _reference_forward(x, params, h0)
        assert lp.shape == ref_lp.shape and hn.shape == ref_hn.shape
        assert bool(jnp.all(jnp.isfinite(lp))) and bool(jnp.all(jnp.isfinite(hn)))
        assert jnp.allclose(lp, ref_lp, atol=5e-4), "log_probs mismatch (f32)"
        assert jnp.allclose(hn, ref_hn, atol=5e-4), "hidden mismatch (f32)"

    # 5) bf16 Stage-1/3 MXU path (v6e/v7x); compare against a bf16-matched reference.
    x5 = jax.random.normal(k_x5, (3, 300, ALPHABET), jnp.float32)
    h05 = jax.random.normal(k_h5, (1, 3, HIDDEN), jnp.float32)
    lp5, hn5 = char_gen_rnn_forward(x5, params, h05, use_bf16_mxu=True)
    jax.block_until_ready((lp5, hn5))
    ref_lp5, ref_hn5 = _reference_forward(x5, params, h05, mxu_dtype=jnp.bfloat16)
    assert jnp.allclose(lp5, ref_lp5, atol=5e-3), "log_probs mismatch (bf16 MXU)"
    assert jnp.allclose(hn5, ref_hn5, atol=5e-3), "hidden mismatch (bf16 MXU)"

    print("KERNEL_OK")
</pallas_src>

<mosaic_0001>
module attributes {stable_mosaic.version = 11 : i64} {
  func.func @_char_gen_rnn_kernel(%arg0: i32, %arg1: i32, %arg2: memref<8x8x32xf32, #tpu.memory_space<vmem>>, %arg3: memref<8x128xf32, #tpu.memory_space<vmem>>, %arg4: memref<32x128xf32, #tpu.memory_space<vmem>>, %arg5: memref<128x128xf32, #tpu.memory_space<vmem>>, %arg6: memref<1x128xf32, #tpu.memory_space<vmem>>, %arg7: memref<128x32xf32, #tpu.memory_space<vmem>>, %arg8: memref<1x32xf32, #tpu.memory_space<vmem>>, %arg9: memref<8x8x32xf32, #tpu.memory_space<vmem>>, %arg10: memref<8x128xf32, #tpu.memory_space<vmem>>, %arg11: memref<8x8x128xf32, #tpu.memory_space<vmem>>, %arg12: memref<8x8x128xf32, #tpu.memory_space<vmem>>) attributes {dimension_semantics = [#tpu.dimension_semantics<parallel>, #tpu.dimension_semantics<arbitrary>], iteration_bounds = array<i64: 1, 1>, scalar_prefetch = 0 : i64, scratch_operands = 2 : i64, tpu.core_type = #tpu.core_type<tc>, window_params = [{transform_indices = @transform_0, window_bounds = array<i64: 8, 8, 32>}, {transform_indices = @transform_1, window_bounds = array<i64: 8, 128>}, {pipeline_mode = #tpu.pipeline_mode<synchronous>, transform_indices = @transform_2, window_bounds = array<i64: 32, 128>}, {pipeline_mode = #tpu.pipeline_mode<synchronous>, transform_indices = @transform_3, window_bounds = array<i64: 128, 128>}, {pipeline_mode = #tpu.pipeline_mode<synchronous>, transform_indices = @transform_4, window_bounds = array<i64: 1, 128>}, {pipeline_mode = #tpu.pipeline_mode<synchronous>, transform_indices = @transform_5, window_bounds = array<i64: 128, 32>}, {pipeline_mode = #tpu.pipeline_mode<synchronous>, transform_indices = @transform_6, window_bounds = array<i64: 1, 32>}, {transform_indices = @transform_7, window_bounds = array<i64: 8, 8, 32>}, {transform_indices = @transform_8, window_bounds = array<i64: 8, 128>}]} {
    %c0_i32 = arith.constant 0 : i32
    %0 = arith.cmpi eq, %arg1, %c0_i32 : i32
    %1 = arith.extui %0 : i1 to i32
    %c0_i32_0 = arith.constant 0 : i32
    %2 = arith.cmpi ne, %1, %c0_i32_0 : i32
    scf.if %2 {
      %c0_75 = arith.constant 0 : index
      %c0_76 = arith.constant 0 : index
      %122 = vector.load %arg3[%c0_75, %c0_76] : memref<8x128xf32, #tpu.memory_space<vmem>>, vector<8x128xf32>
      %c0_77 = arith.constant 0 : index
      %c0_78 = arith.constant 0 : index
      %123 = vector.load %arg10[%c0_77, %c0_78] : memref<8x128xf32, #tpu.memory_space<vmem>>, vector<8x128xf32>
      tpu.vector_store %arg10[%c0_77, %c0_78], %122 {strides = array<i32>} : memref<8x128xf32, #tpu.memory_space<vmem>>, vector<8x128xf32>,
    } else {
    }
    %c0 = arith.constant 0 : index
    %c0_1 = arith.constant 0 : index
    %3 = vector.load %arg4[%c0, %c0_1] : memref<32x128xf32, #tpu.memory_space<vmem>>, vector<32x128xf32>
    %c0_2 = arith.constant 0 : index
    %c0_3 = arith.constant 0 : index
    %4 = vector.load %arg6[%c0_2, %c0_3] : memref<1x128xf32, #tpu.memory_space<vmem>>, vector<1x128xf32>
    %5 = vector.shape_cast %4 : vector<1x128xf32> to vector<1x128xf32>
    %6 = vector.broadcast %5 : vector<1x128xf32> to vector<64x128xf32>
    %c0_4 = arith.constant 0 : index
    %c0_5 = arith.constant 0 : index
    %c0_6 = arith.constant 0 : index
    %7 = vector.load %arg2[%c0_4, %c0_5, %c0_6] : memref<8x8x32xf32, #tpu.memory_space<vmem>>, vector<8x8x32xf32>
    %8 = vector.shape_cast %7 : vector<8x8x32xf32> to vector<64x32xf32>
    %cst = arith.constant dense<0.000000e+00> : vector<64x128xf32>
    %9 = tpu.matmul %8, %3, %cst {dimension_numbers = #tpu.dot_dimension_numbers<[1], [0], [0], [1], [0, 0, 1, 1], [], []>} : vector<64x32xf32>, vector<32x128xf32>, vector<64x128xf32> -> vector<64x128xf32>
    %10 = arith.addf %9, %6 : vector<64x128xf32>
    %11 = vector.shape_cast %10 : vector<64x128xf32> to vector<8x8x128xf32>
    %c0_7 = arith.constant 0 : index
    %c0_8 = arith.constant 0 : index
    %c0_9 = arith.constant 0 : index
    %12 = vector.load %arg11[%c0_7, %c0_8, %c0_9] : memref<8x8x128xf32, #tpu.memory_space<vmem>>, vector<8x8x128xf32>
    tpu.vector_store %arg11[%c0_7, %c0_8, %c0_9], %11 {strides = array<i32>} : memref<8x8x128xf32, #tpu.memory_space<vmem>>, vector<8x8x128xf32>,
    %c0_10 = arith.constant 0 : index
    %c0_11 = arith.constant 0 : index
    %13 = vector.load %arg5[%c0_10, %c0_11] : memref<128x128xf32, #tpu.memory_space<vmem>>, vector<128x128xf32>
    %c0_12 = arith.constant 0 : index
    %c0_13 = arith.constant 0 : index
    %14 = vector.load %arg10[%c0_12, %c0_13] : memref<8x128xf32, #tpu.memory_space<vmem>>, vector<8x128xf32>
    %c0_i32_14 = arith.constant 0 : i32
    %15 = arith.index_cast %c0_i32_14 : i32 to index
    %c0_15 = arith.constant 0 : index
    %c0_16 = arith.constant 0 : index
    %16 = vector.load %arg11[%15, %c0_15, %c0_16] : memref<8x8x128xf32, #tpu.memory_space<vmem>>, vector<1x8x128xf32>
    %17 = vector.shape_cast %16 : vector<1x8x128xf32> to vector<8x128xf32>
    %cst_17 = arith.constant dense<0.000000e+00> : vector<8x128xf32>
    %18 = tpu.matmul %14, %13, %cst_17 {dimension_numbers = #tpu.dot_dimension_numbers<[1], [0], [0], [1], [0, 0, 1, 1], [], []>} : vector<8x128xf32>, vector<128x128xf32>, vector<8x128xf32> -> vector<8x128xf32>
    %19 = arith.addf %17, %18 : vector<8x128xf32>
    %20 = math.tanh %19 : vector<8x128xf32>
    %21 = arith.index_cast %c0_i32_14 : i32 to index
    %c0_18 = arith.constant 0 : index
    %c0_19 = arith.constant 0 : index
    %22 = vector.load %arg12[%21, %c0_18, %c0_19] : memref<8x8x128xf32, #tpu.memory_space<vmem>>, vector<1x8x128xf32>
    %23 = vector.shape_cast %22 : vector<1x8x128xf32> to vector<8x128xf32>
    %24 = vector.shape_cast %20 : vector<8x128xf32> to vector<1x8x128xf32>
    tpu.vector_store %arg12[%21, %c0_18, %c0_19], %24 {strides = array<i32>} : memref<8x8x128xf32, #tpu.memory_space<vmem>>, vector<1x8x128xf32>,
    %c1_i32 = arith.constant 1 : i32
    %25 = arith.index_cast %c1_i32 : i32 to index
    %c0_20 = arith.constant 0 : index
    %c0_21 = arith.constant 0 : index
    %26 = vector.load %arg11[%25, %c0_20, %c0_21] : memref<8x8x128xf32, #tpu.memory_space<vmem>>, vector<1x8x128xf32>
    %27 = vector.shape_cast %26 : vector<1x8x128xf32> to vector<8x128xf32>
    %cst_22 = arith.constant dense<0.000000e+00> : vector<8x128xf32>
    %28 = tpu.matmul %20, %13, %cst_22 {dimension_numbers = #tpu.dot_dimension_numbers<[1], [0], [0], [1], [0, 0, 1, 1], [], []>} : vector<8x128xf32>, vector<128x128xf32>, vector<8x128xf32> -> vector<8x128xf32>
    %29 = arith.addf %27, %28 : vector<8x128xf32>
    %30 = math.tanh %29 : vector<8x128xf32>
    %31 = arith.index_cast %c1_i32 : i32 to index
    %c0_23 = arith.constant 0 : index
    %c0_24 = arith.constant 0 : index
    %32 = vector.load %arg12[%31, %c0_23, %c0_24] : memref<8x8x128xf32, #tpu.memory_space<vmem>>, vector<1x8x128xf32>
    %33 = vector.shape_cast %32 : vector<1x8x128xf32> to vector<8x128xf32>
    %34 = vector.shape_cast %30 : vector<8x128xf32> to vector<1x8x128xf32>
    tpu.vector_store %arg12[%31, %c0_23, %c0_24], %34 {strides = array<i32>} : memref<8x8x128xf32, #tpu.memory_space<vmem>>, vector<1x8x128xf32>,
    %c2_i32 = arith.constant 2 : i32
    %35 = arith.index_cast %c2_i32 : i32 to index
    %c0_25 = arith.constant 0 : index
    %c0_26 = arith.constant 0 : index
    %36 = vector.load %arg11[%35, %c0_25, %c0_26] : memref<8x8x128xf32, #tpu.memory_space<vmem>>, vector<1x8x128xf32>
    %37 = vector.shape_cast %36 : vector<1x8x128xf32> to vector<8x128xf32>
    %cst_27 = arith.constant dense<0.000000e+00> : vector<8x128xf32>
    %38 = tpu.matmul %30, %13, %cst_27 {dimension_numbers = #tpu.dot_dimension_numbers<[1], [0], [0], [1], [0, 0, 1, 1], [], []>} : vector<8x128xf32>, vector<128x128xf32>, vector<8x128xf32> -> vector<8x128xf32>
    %39 = arith.addf %37, %38 : vector<8x128xf32>
    %40 = math.tanh %39 : vector<8x128xf32>
    %41 = arith.index_cast %c2_i32 : i32 to index
    %c0_28 = arith.constant 0 : index
    %c0_29 = arith.constant 0 : index
    %42 = vector.load %arg12[%41, %c0_28, %c0_29] : memref<8x8x128xf32, #tpu.memory_space<vmem>>, vector<1x8x128xf32>
    %43 = vector.shape_cast %42 : vector<1x8x128xf32> to vector<8x128xf32>
    %44 = vector.shape_cast %40 : vector<8x128xf32> to vector<1x8x128xf32>
    tpu.vector_store %arg12[%41, %c0_28, %c0_29], %44 {strides = array<i32>} : memref<8x8x128xf32, #tpu.memory_space<vmem>>, vector<1x8x128xf32>,
    %c3_i32 = arith.constant 3 : i32
    %45 = arith.index_cast %c3_i32 : i32 to index
    %c0_30 = arith.constant 0 : index
    %c0_31 = arith.constant 0 : index
    %46 = vector.load %arg11[%45, %c0_30, %c0_31] : memref<8x8x128xf32, #tpu.memory_space<vmem>>, vector<1x8x128xf32>
    %47 = vector.shape_cast %46 : vector<1x8x128xf32> to vector<8x128xf32>
    %cst_32 = arith.constant dense<0.000000e+00> : vector<8x128xf32>
    %48 = tpu.matmul %40, %13, %cst_32 {dimension_numbers = #tpu.dot_dimension_numbers<[1], [0], [0], [1], [0, 0, 1, 1], [], []>} : vector<8x128xf32>, vector<128x128xf32>, vector<8x128xf32> -> vector<8x128xf32>
    %49 = arith.addf %47, %48 : vector<8x128xf32>
    %50 = math.tanh %49 : vector<8x128xf32>
    %51 = arith.index_cast %c3_i32 : i32 to index
    %c0_33 = arith.constant 0 : index
    %c0_34 = arith.constant 0 : index
    %52 = vector.load %arg12[%51, %c0_33, %c0_34] : memref<8x8x128xf32, #tpu.memory_space<vmem>>, vector<1x8x128xf32>
    %53 = vector.shape_cast %52 : vector<1x8x128xf32> to vector<8x128xf32>
    %54 = vector.shape_cast %50 : vector<8x128xf32> to vector<1x8x128xf32>
    tpu.vector_store %arg12[%51, %c0_33, %c0_34], %54 {strides = array<i32>} : memref<8x8x128xf32, #tpu.memory_space<vmem>>, vector<1x8x128xf32>,
    %c4_i32 = arith.constant 4 : i32
    %55 = arith.index_cast %c4_i32 : i32 to index
    %c0_35 = arith.constant 0 : index
    %c0_36 = arith.constant 0 : index
    %56 = vector.load %arg11[%55, %c0_35, %c0_36] : memref<8x8x128xf32, #tpu.memory_space<vmem>>, vector<1x8x128xf32>
    %57 = vector.shape_cast %56 : vector<1x8x128xf32> to vector<8x128xf32>
    %cst_37 = arith.constant dense<0.000000e+00> : vector<8x128xf32>
    %58 = tpu.matmul %50, %13, %cst_37 {dimension_numbers = #tpu.dot_dimension_numbers<[1], [0], [0], [1], [0, 0, 1, 1], [], []>} : vector<8x128xf32>, vector<128x128xf32>, vector<8x128xf32> -> vector<8x128xf32>
    %59 = arith.addf %57, %58 : vector<8x128xf32>
    %60 = math.tanh %59 : vector<8x128xf32>
    %61 = arith.index_cast %c4_i32 : i32 to index
    %c0_38 = arith.constant 0 : index
    %c0_39 = arith.constant 0 : index
    %62 = vector.load %arg12[%61, %c0_38, %c0_39] : memref<8x8x128xf32, #tpu.memory_space<vmem>>, vector<1x8x128xf32>
    %63 = vector.shape_cast %62 : vector<1x8x128xf32> to vector<8x128xf32>
    %64 = vector.shape_cast %60 : vector<8x128xf32> to vector<1x8x128xf32>
    tpu.vector_store %arg12[%61, %c0_38, %c0_39], %64 {strides = array<i32>} : memref<8x8x128xf32, #tpu.memory_space<vmem>>, vector<1x8x128xf32>,
    %c5_i32 = arith.constant 5 : i32
    %65 = arith.index_cast %c5_i32 : i32 to index
    %c0_40 = arith.constant 0 : index
    %c0_41 = arith.constant 0 : index
    %66 = vector.load %arg11[%65, %c0_40, %c0_41] : memref<8x8x128xf32, #tpu.memory_space<vmem>>, vector<1x8x128xf32>
    %67 = vector.shape_cast %66 : vector<1x8x128xf32> to vector<8x128xf32>
    %cst_42 = arith.constant dense<0.000000e+00> : vector<8x128xf32>
    %68 = tpu.matmul %60, %13, %cst_42 {dimension_numbers = #tpu.dot_dimension_numbers<[1], [0], [0], [1], [0, 0, 1, 1], [], []>} : vector<8x128xf32>, vector<128x128xf32>, vector<8x128xf32> -> vector<8x128xf32>
    %69 = arith.addf %67, %68 : vector<8x128xf32>
    %70 = math.tanh %69 : vector<8x128xf32>
    %71 = arith.index_cast %c5_i32 : i32 to index
    %c0_43 = arith.constant 0 : index
    %c0_44 = arith.constant 0 : index
    %72 = vector.load %arg12[%71, %c0_43, %c0_44] : memref<8x8x128xf32, #tpu.memory_space<vmem>>, vector<1x8x128xf32>
    %73 = vector.shape_cast %72 : vector<1x8x128xf32> to vector<8x128xf32>
    %74 = vector.shape_cast %70 : vector<8x128xf32> to vector<1x8x128xf32>
    tpu.vector_store %arg12[%71, %c0_43, %c0_44], %74 {strides = array<i32>} : memref<8x8x128xf32, #tpu.memory_space<vmem>>, vector<1x8x128xf32>,
    %c6_i32 = arith.constant 6 : i32
    %75 = arith.index_cast %c6_i32 : i32 to index
    %c0_45 = arith.constant 0 : index
    %c0_46 = arith.constant 0 : index
    %76 = vector.load %arg11[%75, %c0_45, %c0_46] : memref<8x8x128xf32, #tpu.memory_space<vmem>>, vector<1x8x128xf32>
    %77 = vector.shape_cast %76 : vector<1x8x128xf32> to vector<8x128xf32>
    %cst_47 = arith.constant dense<0.000000e+00> : vector<8x128xf32>
    %78 = tpu.matmul %70, %13, %cst_47 {dimension_numbers = #tpu.dot_dimension_numbers<[1], [0], [0], [1], [0, 0, 1, 1], [], []>} : vector<8x128xf32>, vector<128x128xf32>, vector<8x128xf32> -> vector<8x128xf32>
    %79 = arith.addf %77, %78 : vector<8x128xf32>
    %80 = math.tanh %79 : vector<8x128xf32>
    %81 = arith.index_cast %c6_i32 : i32 to index
    %c0_48 = arith.constant 0 : index
    %c0_49 = arith.constant 0 : index
    %82 = vector.load %arg12[%81, %c0_48, %c0_49] : memref<8x8x128xf32, #tpu.memory_space<vmem>>, vector<1x8x128xf32>
    %83 = vector.shape_cast %82 : vector<1x8x128xf32> to vector<8x128xf32>
    %84 = vector.shape_cast %80 : vector<8x128xf32> to vector<1x8x128xf32>
    tpu.vector_store %arg12[%81, %c0_48, %c0_49], %84 {strides = array<i32>} : memref<8x8x128xf32, #tpu.memory_space<vmem>>, vector<1x8x128xf32>,
    %c7_i32 = arith.constant 7 : i32
    %85 = arith.index_cast %c7_i32 : i32 to index
    %c0_50 = arith.constant 0 : index
    %c0_51 = arith.constant 0 : index
    %86 = vector.load %arg11[%85, %c0_50, %c0_51] : memref<8x8x128xf32, #tpu.memory_space<vmem>>, vector<1x8x128xf32>
    %87 = vector.shape_cast %86 : vector<1x8x128xf32> to vector<8x128xf32>
    %cst_52 = arith.constant dense<0.000000e+00> : vector<8x128xf32>
    %88 = tpu.matmul %80, %13, %cst_52 {dimension_numbers = #tpu.dot_dimension_numbers<[1], [0], [0], [1], [0, 0, 1, 1], [], []>} : vector<8x128xf32>, vector<128x128xf32>, vector<8x128xf32> -> vector<8x128xf32>
    %89 = arith.addf %87, %88 : vector<8x128xf32>
    %90 = math.tanh %89 : vector<8x128xf32>
    %91 = arith.index_cast %c7_i32 : i32 to index
    %c0_53 = arith.constant 0 : index
    %c0_54 = arith.constant 0 : index
    %92 = vector.load %arg12[%91, %c0_53, %c0_54] : memref<8x8x128xf32, #tpu.memory_space<vmem>>, vector<1x8x128xf32>
    %93 = vector.shape_cast %92 : vector<1x8x128xf32> to vector<8x128xf32>
    %94 = vector.shape_cast %90 : vector<8x128xf32> to vector<1x8x128xf32>
    tpu.vector_store %arg12[%91, %c0_53, %c0_54], %94 {strides = array<i32>} : memref<8x8x128xf32, #tpu.memory_space<vmem>>, vector<1x8x128xf32>,
    %c8_i32 = arith.constant 8 : i32
    %c8_i32_55 = arith.constant 8 : i32
    %95 = arith.muli %arg1, %c8_i32_55 : i32
    %c7_i32_56 = arith.constant 7 : i32
    %96 = arith.subi %c7_i32_56, %95 : i32
    %c7_i32_57 = arith.constant 7 : i32
    %97 = arith.minsi %c7_i32_57, %96 : i32
    %98 = arith.index_cast %97 : i32 to index
    %c0_58 = arith.constant 0 : index
    %c0_59 = arith.constant 0 : index
    %99 = vector.load %arg12[%98, %c0_58, %c0_59] : memref<8x8x128xf32, #tpu.memory_space<vmem>>, vector<1x8x128xf32>
    %100 = vector.shape_cast %99 : vector<1x8x128xf32> to vector<8x128xf32>
    %c0_60 = arith.constant 0 : index
    %c0_61 = arith.constant 0 : index
    %101 = vector.load %arg10[%c0_60, %c0_61] : memref<8x128xf32, #tpu.memory_space<vmem>>, vector<8x128xf32>
    tpu.vector_store %arg10[%c0_60, %c0_61], %100 {strides = array<i32>} : memref<8x128xf32, #tpu.memory_space<vmem>>, vector<8x128xf32>,
    %c0_62 = arith.constant 0 : index
    %c0_63 = arith.constant 0 : index
    %102 = vector.load %arg7[%c0_62, %c0_63] : memref<128x32xf32, #tpu.memory_space<vmem>>, vector<128x32xf32>
    %c0_64 = arith.constant 0 : index
    %c0_65 = arith.constant 0 : index
    %103 = vector.load %arg8[%c0_64, %c0_65] : memref<1x32xf32, #tpu.memory_space<vmem>>, vector<1x32xf32>
    %104 = vector.shape_cast %103 : vector<1x32xf32> to vector<1x32xf32>
    %105 = vector.broadcast %104 : vector<1x32xf32> to vector<64x32xf32>
    %c0_66 = arith.constant 0 : index
    %c0_67 = arith.constant 0 : index
    %c0_68 = arith.constant 0 : index
    %106 = vector.load %arg12[%c0_66, %c0_67, %c0_68] : memref<8x8x128xf32, #tpu.memory_space<vmem>>, vector<8x8x128xf32>
    %107 = vector.shape_cast %106 : vector<8x8x128xf32> to vector<64x128xf32>
    %cst_69 = arith.constant dense<0.000000e+00> : vector<64x32xf32>
    %108 = tpu.matmul %107, %102, %cst_69 {dimension_numbers = #tpu.dot_dimension_numbers<[1], [0], [0], [1], [0, 0, 1, 1], [], []>} : vector<64x128xf32>, vector<128x32xf32>, vector<64x32xf32> -> vector<64x32xf32>
    %109 = arith.addf %108, %105 : vector<64x32xf32>
    %cst_70 = arith.constant dense<0xFF800000> : vector<64xf32>
    %110 = vector.multi_reduction <maximumf>, %109, %cst_70 [1] : vector<64x32xf32> to vector<64xf32>
    %111 = vector.shape_cast %110 : vector<64xf32> to vector<64x1xf32>
    %112 = vector.broadcast %111 : vector<64x1xf32> to vector<64x32xf32>
    %113 = arith.subf %109, %112 : vector<64x32xf32>
    %114 = math.exp %113 : vector<64x32xf32>
    %cst_71 = arith.constant dense<0.000000e+00> : vector<64xf32>
    %115 = vector.multi_reduction <add>, %114, %cst_71 [1] : vector<64x32xf32> to vector<64xf32>
    %116 = vector.shape_cast %115 : vector<64xf32> to vector<64x1xf32>
    %117 = math.log %116 : vector<64x1xf32>
    %118 = vector.broadcast %117 : vector<64x1xf32> to vector<64x32xf32>
    %119 = arith.subf %113, %118 : vector<64x32xf32>
    %120 = vector.shape_cast %119 : vector<64x32xf32> to vector<8x8x32xf32>
    %c0_72 = arith.constant 0 : index
    %c0_73 = arith.constant 0 : index
    %c0_74 = arith.constant 0 : index
    %121 = vector.load %arg9[%c0_72, %c0_73, %c0_74] : memref<8x8x32xf32, #tpu.memory_space<vmem>>, vector<8x8x32xf32>
    tpu.vector_store %arg9[%c0_72, %c0_73, %c0_74], %120 {strides = array<i32>} : memref<8x8x32xf32, #tpu.memory_space<vmem>>, vector<8x8x32xf32>,
    return
  }
  func.func @transform_0(%arg0: i32, %arg1: i32) -> (i32, i32, i32) {
    %c0_i32 = arith.constant 0 : i32
    %c0_i32_0 = arith.constant 0 : i32
    return %arg1, %arg0, %c0_i32 : i32, i32, i32
  }
  func.func @transform_1(%arg0: i32, %arg1: i32) -> (i32, i32) {
    %c0_i32 = arith.constant 0 : i32
    %c0_i32_0 = arith.constant 0 : i32
    return %arg0, %c0_i32 : i32, i32
  }
  func.func @transform_2(%arg0: i32, %arg1: i32) -> (i32, i32) {
    %c0_i32 = arith.constant 0 : i32
    %c0_i32_0 = arith.constant 0 : i32
    %c0_i32_1 = arith.constant 0 : i32
    return %c0_i32, %c0_i32_0 : i32, i32
  }
  func.func @transform_3(%arg0: i32, %arg1: i32) -> (i32, i32) {
    %c0_i32 = arith.constant 0 : i32
    %c0_i32_0 = arith.constant 0 : i32
    %c0_i32_1 = arith.constant 0 : i32
    return %c0_i32, %c0_i32_0 : i32, i32
  }
  func.func @transform_4(%arg0: i32, %arg1: i32) -> (i32, i32) {
    %c0_i32 = arith.constant 0 : i32
    %c0_i32_0 = arith.constant 0 : i32
    %c0_i32_1 = arith.constant 0 : i32
    return %c0_i32, %c0_i32_0 : i32, i32
  }
  func.func @transform_5(%arg0: i32, %arg1: i32) -> (i32, i32) {
    %c0_i32 = arith.constant 0 : i32
    %c0_i32_0 = arith.constant 0 : i32
    %c0_i32_1 = arith.constant 0 : i32
    return %c0_i32, %c0_i32_0 : i32, i32
  }
  func.func @transform_6(%arg0: i32, %arg1: i32) -> (i32, i32) {
    %c0_i32 = arith.constant 0 : i32
    %c0_i32_0 = arith.constant 0 : i32
    %c0_i32_1 = arith.constant 0 : i32
    return %c0_i32, %c0_i32_0 : i32, i32
  }
  func.func @transform_7(%arg0: i32, %arg1: i32) -> (i32, i32, i32) {
    %c0_i32 = arith.constant 0 : i32
    %c0_i32_0 = arith.constant 0 : i32
    return %arg1, %arg0, %c0_i32 : i32, i32, i32
  }
  func.func @transform_8(%arg0: i32, %arg1: i32) -> (i32, i32) {
    %c0_i32 = arith.constant 0 : i32
    %c0_i32_0 = arith.constant 0 : i32
    return %arg0, %c0_i32 : i32, i32
  }
}

</mosaic_0001>

<bundles_post_ra>
// kernel: char_gen_rnn_forward.1
= control target key start
LH: loop header
LB: loop body
LE: loop exit
PB: predicated region body
PF: predicated region fallthrough
CT: control target
= control target key end

     0   :  { %v1648_v0 = vmov 0.0   ;;  %vm1649_vm0 = vmmov 0   ;;  %vm53_vm1 = vcmask 261120   ;;  %s2265_s3 = inlined_call_operand.vmem [shape: f32[128,128], index: 3, kind: input, shape index: {}]   ;;  %s2266_s2 = inlined_call_operand.vmem [shape: f32[32,128], index: 2, kind: input, shape index: {}]   ;;  %s2267_s0 = inlined_call_operand.vmem [shape: f32[8,8,32], index: 0, kind: input, shape index: {}]   ;;  %s2268_s1 = inlined_call_operand.vmem [shape: f32[8,128], index: 1, kind: input, shape index: {}]   ;;  %s2269_s4 = inlined_call_operand.vmem [shape: f32[1,128], index: 4, kind: input, shape index: {}]   ;;  %s2270_s5 = inlined_call_operand.vmem [shape: f32[128,32], index: 5, kind: input, shape index: {}]   ;;  %s2271_s6 = inlined_call_operand.vmem [shape: f32[1,32], index: 6, kind: input, shape index: {}]   ;;  %s2272_s8 = inlined_call_operand.vmem [shape: f32[8,128], index: 8, kind: output, shape index: {1}]   ;;  %s2273_s7 = inlined_call_operand.vmem [shape: f32[8,8,32], index: 7, kind: output, shape index: {0}]  }
   0x1   :  { %1274 = vmatprep.subr.mxu0 %v1648_v0  ;;  %v1699_v1 = vld [vmem:[%s2265_s3 + $0x78] sm:$0xff]  ;;  %v1704_v2 = vld [vmem:[%s2265_s3 + $0x70] sm:$0xff]  ;;  %1306 = vmatprep.mubr.msk.f32.mxu0 %vm1649_vm0, %v1648_v0  ;;  %v1713_v3 = vld [vmem:[%s2265_s3 + $0x68] sm:$0xff] }
   0x2   :  { %1275 = vmatpush3.msra.mxu0 %v1699_v1  ;;  %v37_v4 = vld [vmem:[%s2266_s2 + $0x18] sm:$0xff]  ;;  %v36_v5 = vld [vmem:[%s2266_s2 + $0x10] sm:$0xff]  ;;  %v1726_v6 = vld [vmem:[%s2265_s3 + $0x60] sm:$0xff] }
   0x3   :  { %1276 = vmatprep.subr.mxu0 %v1648_v0  ;;  %1254 = vmatprep.subr.mxu1 %v37_v4  ;;  %v35_v7 = vld [vmem:[%s2266_s2 + $0x8] sm:$0xff]  ;;  %v1736_v8 = vld [vmem:[%s2265_s3 + $0x58] sm:$0xff]  ;;  %v34_v9 = vld [vmem:[%s2266_s2] sm:$0xff] }
   0x4   :  { %1277 = vmatpush3.msra.mxu0 %v1704_v2  ;;  %1255 = vmatpush3.msra.mxu1 %v37_v4  ;;  %v1746_v10 = vld [vmem:[%s2265_s3 + $0x50] sm:$0xff]  ;;  %v45_v11 = vld [vmem:[%s2267_s0] sm:$0xff]  ;;  %v1756_v12 = vld [vmem:[%s2265_s3 + $0x48] sm:$0xff] }
   0x5   :  { %1278 = vmatprep.subr.mxu0 %v1648_v0  ;;  %1256 = vmatprep.subr.mxu1 %v36_v5  ;;  %v46_v13 = vld [vmem:[%s2267_s0 + $0x8] sm:$0xff]  ;;  %v1766_v14 = vld [vmem:[%s2265_s3 + $0x40] sm:$0xff]  ;;  %v1775_v15 = vld [vmem:[%s2265_s3 + $0x38] sm:$0xff] }
   0x6   :  { %1279 = vmatpush3.msra.mxu0 %v1713_v3  ;;  %1257 = vmatpush3.msra.mxu1 %v36_v5  ;;  %v1784_v16 = vld [vmem:[%s2265_s3 + $0x30] sm:$0xff]  ;;  %v1793_v17 = vld [vmem:[%s2265_s3 + $0x28] sm:$0xff]  ;;  %v1802_v18 = vld [vmem:[%s2265_s3 + $0x20] sm:$0xff] }
   0x7   :  { %1280 = vmatprep.subr.mxu0 %v1648_v0  ;;  %1258 = vmatprep.subr.mxu1 %v35_v7  ;;  %v1811_v19 = vld [vmem:[%s2265_s3 + $0x18] sm:$0xff]  ;;  %v1820_v20 = vld [vmem:[%s2265_s3 + $0x10] sm:$0xff]  ;;  %v1829_v21 = vld [vmem:[%s2265_s3 + $0x8] sm:$0xff] }
   0x8   :  { %1281 = vmatpush3.msra.mxu0 %v1726_v6  ;;  %1259 = vmatpush3.msra.mxu1 %v35_v7  ;;  %v1838_v22 = vld [vmem:[%s2265_s3] sm:$0xff]  ;;  %v47_v32 = vld [vmem:[%s2267_s0 + $0x10] sm:$0xff]  ;;  %v48_v33 = vld [vmem:[%s2267_s0 + $0x18] sm:$0xff] }
   0x9   :  { %1282 = vmatprep.subr.mxu0 %v1648_v0  ;;  %1260 = vmatprep.subr.mxu1 %v34_v9  ;;  %v32_v23 = vld [vmem:[%s2268_s1] sm:$0xff]  ;;  %v50_v35 = vld [vmem:[%s2267_s0 + $0x28] sm:$0xff]  ;;  %v51_v36 = vld [vmem:[%s2267_s0 + $0x30] sm:$0xff] }
   0xa   :  { %1283 = vmatpush3.msra.mxu0 %v1736_v8  ;;  %1261 = vmatpush3.msra.mxu1 %v34_v9  ;;  %v1903_v25 = vld [vmem:[%s2269_s4] ss:$0 sm:$0xff]  ;;  %v52_v37 = vld [vmem:[%s2267_s0 + $0x38] sm:$0xff]  ;;  %v836_v7 = vld [vmem:[%s2270_s5 + $0x70] sm:$0xff] }
   0xb   :  { %1284 = vmatprep.subr.mxu0 %v1648_v0  ;;  %1262 = vmatprep.mubr.msk.f32.mxu1 %vm53_vm1, %v45_v11  ;;  %v49_v34 = vld [vmem:[%s2267_s0 + $0x20] sm:$0xff]  ;;  %v833_v9 = vld [vmem:[%s2270_s5 + $0x58] sm:$0xff]  ;;  %v831_v11 = vld [vmem:[%s2270_s5 + $0x48] sm:$0xff] }
   0xc   :  { %1285 = vmatpush3.msra.mxu0 %v1746_v10  ;;  %1263 = vmatmul.mubr.msk.f32.vlgmr.msra.gmra.mxu1 %vm53_vm1, %v46_v13  ;;  %v829_v13 = vld [vmem:[%s2270_s5 + $0x38] sm:$0xff] }
   0xd   :  { %1286 = vmatprep.subr.mxu0 %v1648_v0  ;;  %1344 = vmatprep.subr.mxu1 %v1648_v0 }
   0xe   :  { %1287 = vmatpush3.msra.mxu0 %v1756_v12  ;;  %1345 = vmatpush3.msra.mxu1 %v1699_v1 }
   0xf   :  { %1288 = vmatprep.subr.mxu0 %v1648_v0  ;;  %1346 = vmatprep.subr.mxu1 %v1648_v0 }
  0x10   :  { %1289 = vmatpush3.msra.mxu0 %v1766_v14  ;;  %1347 = vmatpush3.msra.mxu1 %v1704_v2 }
  0x11   :  { %1290 = vmatprep.subr.mxu0 %v1648_v0  ;;  %1348 = vmatprep.subr.mxu1 %v1648_v0 }
  0x12   :  { %1291 = vmatpush3.msra.mxu0 %v1775_v15  ;;  %1349 = vmatpush3.msra.mxu1 %v1713_v3 }
  0x13   :  { %1292 = vmatprep.subr.mxu0 %v1648_v0  ;;  %1350 = vmatprep.subr.mxu1 %v1648_v0 }
  0x14   :  { %1293 = vmatpush3.msra.mxu0 %v1784_v16  ;;  %1351 = vmatpush3.msra.mxu1 %v1726_v6 }
  0x15   :  { %1294 = vmatprep.subr.mxu0 %v1648_v0  ;;  %1352 = vmatprep.subr.mxu1 %v1648_v0 }
  0x16   :  { %1295 = vmatpush3.msra.mxu0 %v1793_v17  ;;  %1353 = vmatpush3.msra.mxu1 %v1736_v8 }
  0x17   :  { %1296 = vmatprep.subr.mxu0 %v1648_v0  ;;  %1354 = vmatprep.subr.mxu1 %v1648_v0 }
  0x18   :  { %1297 = vmatpush3.msra.mxu0 %v1802_v18  ;;  %1355 = vmatpush3.msra.mxu1 %v1746_v10 }
  0x19   :  { %1298 = vmatprep.subr.mxu0 %v1648_v0  ;;  %1356 = vmatprep.subr.mxu1 %v1648_v0 }
  0x1a   :  { %1299 = vmatpush3.msra.mxu0 %v1811_v19  ;;  %1357 = vmatpush3.msra.mxu1 %v1756_v12 }
  0x1b   :  { %1300 = vmatprep.subr.mxu0 %v1648_v0  ;;  %1358 = vmatprep.subr.mxu1 %v1648_v0 }
  0x1c   :  { %1301 = vmatpush3.msra.mxu0 %v1820_v20  ;;  %1359 = vmatpush3.msra.mxu1 %v1766_v14 }
  0x1d   :  { %1302 = vmatprep.subr.mxu0 %v1648_v0  ;;  %1360 = vmatprep.subr.mxu1 %v1648_v0 }
  0x1e   :  { %1303 = vmatpush3.msra.mxu0 %v1829_v21  ;;  %1361 = vmatpush3.msra.mxu1 %v1775_v15 }
  0x1f   :  { %1304 = vmatprep.subr.mxu0 %v1648_v0  ;;  %1362 = vmatprep.subr.mxu1 %v1648_v0 }
  0x20   :  { %1305 = vmatpush3.msra.mxu0 %v1838_v22  ;;  %1363 = vmatpush3.msra.mxu1 %v1784_v16 }
  0x21   :  { %1307 = vmatmul.mubr.f32.vlgmr.msra.gmra.mxu0 %v32_v23  ;;  %1309 = vmatprep.subr.mxu0 %v1648_v0 }
  0x22   :  { %1310 = vmatpush3.msra.mxu0 %v1699_v1  ;;  %1341 = vmatprep.mubr.msk.f32.mxu0 %vm1649_vm0, %v1648_v0 }
  0x23   :  { %1311 = vmatprep.subr.mxu0 %v1648_v0  ;;  %1364 = vmatprep.subr.mxu1 %v1648_v0 }
  0x24   :  { %1312 = vmatpush3.msra.mxu0 %v1704_v2  ;;  %1365 = vmatpush3.msra.mxu1 %v1793_v17 }
  0x25   :  { %1313 = vmatprep.subr.mxu0 %v1648_v0  ;;  %1366 = vmatprep.subr.mxu1 %v1648_v0 }
  0x26   :  { %1314 = vmatpush3.msra.mxu0 %v1713_v3  ;;  %1367 = vmatpush3.msra.mxu1 %v1802_v18 }
  0x27   :  { %1315 = vmatprep.subr.mxu0 %v1648_v0  ;;  %1368 = vmatprep.subr.mxu1 %v1648_v0 }
  0x28   :  { %1316 = vmatpush3.msra.mxu0 %v1726_v6  ;;  %1369 = vmatpush3.msra.mxu1 %v1811_v19 }
  0x29   :  { %1317 = vmatprep.subr.mxu0 %v1648_v0  ;;  %1370 = vmatprep.subr.mxu1 %v1648_v0 }
  0x2a   :  { %1318 = vmatpush3.msra.mxu0 %v1736_v8  ;;  %1371 = vmatpush3.msra.mxu1 %v1820_v20 }
  0x2b   :  { %1319 = vmatprep.subr.mxu0 %v1648_v0  ;;  %1372 = vmatprep.subr.mxu1 %v1648_v0 }
  0x2c   :  { %1320 = vmatpush3.msra.mxu0 %v1746_v10  ;;  %1373 = vmatpush3.msra.mxu1 %v1829_v21 }
  0x2d   :  { %1321 = vmatprep.subr.mxu0 %v1648_v0  ;;  %1374 = vmatprep.subr.mxu1 %v1648_v0 }
  0x2e   :  { %1322 = vmatpush3.msra.mxu0 %v1756_v12  ;;  %1375 = vmatpush3.msra.mxu1 %v1838_v22 }
  0x2f   :  { %1323 = vmatprep.subr.mxu0 %v1648_v0  ;;  %1414 = vmatprep.subr.mxu1 %v1648_v0 }
  0x30   :  { %1324 = vmatpush3.msra.mxu0 %v1766_v14  ;;  %1265 = vmatprep.mubr.msk.f32.mxu1 %vm53_vm1, %v47_v32 }
  0x31   :  { %1325 = vmatprep.subr.mxu0 %v1648_v0  ;;  %1266 = vmatmul.mubr.msk.f32.gmra.mxu1 %vm53_vm1, %v48_v33 }
  0x32   :  { %1326 = vmatpush3.msra.mxu0 %v1775_v15  ;;  %1268 = vmatprep.mubr.msk.f32.mxu1 %vm53_vm1, %v49_v34 }
  0x33   :  { %1327 = vmatprep.subr.mxu0 %v1648_v0 }
  0x34   :  { %1328 = vmatpush3.msra.mxu0 %v1784_v16 }
  0x35   :  { %1329 = vmatprep.subr.mxu0 %v1648_v0  ;;  %1269 = vmatmul.mubr.msk.f32.gmra.mxu1 %vm53_vm1, %v50_v35 }
  0x36   :  { %1330 = vmatpush3.msra.mxu0 %v1793_v17  ;;  %1271 = vmatprep.mubr.msk.f32.mxu1 %vm53_vm1, %v51_v36 }
  0x37   :  { %1331 = vmatprep.subr.mxu0 %v1648_v0 }
  0x38   :  { %1332 = vmatpush3.msra.mxu0 %v1802_v18 }
  0x39   :  { %1333 = vmatprep.subr.mxu0 %v1648_v0  ;;  %1272 = vmatmul.mubr.msk.f32.gmra.mxu1 %vm53_vm1, %v52_v37 }
  0x3a   :  { %1334 = vmatpush3.msra.mxu0 %v1811_v19  ;;  %1376 = vmatprep.mubr.msk.f32.mxu1 %vm1649_vm0, %v1648_v0 }
  0x3b   :  { %1335 = vmatprep.subr.mxu0 %v1648_v0 }
  0x3c   :  { %1336 = vmatpush3.msra.mxu0 %v1820_v20 }
  0x3d   :  { %1337 = vmatprep.subr.mxu0 %v1648_v0 }
  0x3e   :  { %1338 = vmatpush3.msra.mxu0 %v1829_v21 }
  0x3f   :  { %1339 = vmatprep.subr.mxu0 %v1648_v0 }
  0x40   :  { %1340 = vmatpush3.msra.mxu0 %v1838_v22 }
  0x41   :  { %1379 = vmatprep.subr.mxu0 %v1648_v0 }
  0xcc   :  { %v1264_v24 = vpop.f32.mrf.mxu1 }
  0xcd   :  { %v150_v38 = vadd.f32 %v1264_v24, %v1903_v25 }
  0xce   :  { %v144_v26 = vpop.f32.mrf.mxu1 }
  0xcf   :  { %v145_v27 = vadd.f32 %v1903_v25, %v144_v26 }
  0xe1   :  { %v275_v28 = vpop.f32.mrf.mxu0 }
  0xe2   :  { %v279_v29 = vadd.f32 %v275_v28, %v145_v27  ;;  %v1081_v27 = vld [vmem:[%s2271_s6] ss:$0 sm:$0xff] }
  0xe3   :  { %v1308_v30 = vpop.f32.mrf.mxu0 }
  0xe4   :  { %1600 = vtanh.f32 %v279_v29 }
  0xf1   :  { %v1906_v31 = vpop.eup %1600  ;;  %v1267_v43 = vpop.f32.mrf.mxu1 }
  0xf2   :  { %1342 = vmatmul.mubr.f32.vlgmr.msra.gmra.mxu0 %v1906_v31  ;;  %v160_v54 = vadd.f32 %v1267_v43, %v1903_v25 }
  0xf3   :  { %1380 = vmatpush3.msra.mxu0 %v1699_v1  ;;  %1411 = vmatprep.mubr.msk.f32.mxu0 %vm1649_vm0, %v1648_v0  ;;  %v154_v44 = vpop.f32.mrf.mxu1 }
  0xf4   :  { %1381 = vmatprep.subr.mxu0 %v1648_v0  ;;  %v155_v49 = vadd.f32 %v1903_v25, %v154_v44 }
  0xf5   :  { %1382 = vmatpush3.msra.mxu0 %v1704_v2  ;;  %v2007_v45 = vpop.f32.mrf.mxu1 }
  0xf6   :  { %1383 = vmatprep.subr.mxu0 %v1648_v0 }
  0xf7   :  { %1384 = vmatpush3.msra.mxu0 %v1713_v3  ;;  %v2009_v46 = vpop.f32.mrf.mxu1 }
  0xf8   :  { %1385 = vmatprep.subr.mxu0 %v1648_v0  ;;  %v165_v59 = vadd.f32 %v1903_v25, %v2009_v46 }
  0xf9   :  { %1386 = vmatpush3.msra.mxu0 %v1726_v6  ;;  %v2011_v47 = vpop.f32.mrf.mxu1 }
  0xfa   :  { %1387 = vmatprep.subr.mxu0 %v1648_v0  ;;  %v180_v46 = vadd.f32 %v2011_v47, %v1903_v25 }
  0xfb   :  { %1388 = vmatpush3.msra.mxu0 %v1736_v8  ;;  %v2013_v48 = vpop.f32.mrf.mxu1 }
  0xfc   :  { %1389 = vmatprep.subr.mxu0 %v1648_v0 }
  0xfd   :  { %1390 = vmatpush3.msra.mxu0 %v1746_v10 }
  0xfe   :  { %1391 = vmatprep.subr.mxu0 %v1648_v0 }
  0xff   :  { %1392 = vmatpush3.msra.mxu0 %v1756_v12 }
 0x100   :  { %1393 = vmatprep.subr.mxu0 %v1648_v0 }
 0x101   :  { %1394 = vmatpush3.msra.mxu0 %v1766_v14 }
 0x102   :  { %1395 = vmatprep.subr.mxu0 %v1648_v0 }
 0x103   :  { %1396 = vmatpush3.msra.mxu0 %v1775_v15 }
 0x104   :  { %1397 = vmatprep.subr.mxu0 %v1648_v0 }
 0x105   :  { %1398 = vmatpush3.msra.mxu0 %v1784_v16 }
 0x106   :  { %1399 = vmatprep.subr.mxu0 %v1648_v0 }
 0x107   :  { %1400 = vmatpush3.msra.mxu0 %v1793_v17 }
 0x108   :  { %1401 = vmatprep.subr.mxu0 %v1648_v0 }
 0x109   :  { %1402 = vmatpush3.msra.mxu0 %v1802_v18 }
 0x10a   :  { %1403 = vmatprep.subr.mxu0 %v1648_v0 }
 0x10b   :  { %1404 = vmatpush3.msra.mxu0 %v1811_v19 }
 0x10c   :  { %1405 = vmatprep.subr.mxu0 %v1648_v0 }
 0x10d   :  { %1406 = vmatpush3.msra.mxu0 %v1820_v20 }
 0x10e   :  { %1407 = vmatprep.subr.mxu0 %v1648_v0 }
 0x10f   :  { %1408 = vmatpush3.msra.mxu0 %v1829_v21 }
 0x110   :  { %1409 = vmatprep.subr.mxu0 %v1648_v0 }
 0x111   :  { %1410 = vmatpush3.msra.mxu0 %v1838_v22 }
 0x112   :  { %1449 = vmatprep.subr.mxu0 %v1648_v0 }
 0x1b2   :  { %v350_v39 = vpop.f32.mrf.mxu0 }
 0x1b3   :  { %v354_v40 = vadd.f32 %v350_v39, %v150_v38 }
 0x1b4   :  { %v1343_v41 = vpop.f32.mrf.mxu0 }
 0x1b5   :  { %1602 = vtanh.f32 %v354_v40 }
 0x1c2   :  { %v1970_v42 = vpop.eup %1602 }
 0x1c3   :  { %1377 = vmatmul.mubr.f32.vlgmr.msra.gmra.mxu1 %v1970_v42 }
 0x1c4   :  { %1415 = vmatpush3.msra.mxu1 %v1699_v1  ;;  %1446 = vmatprep.mubr.msk.f32.mxu1 %vm1649_vm0, %v1648_v0 }
 0x1c5   :  { %1416 = vmatprep.subr.mxu1 %v1648_v0 }
 0x1c6   :  { %1417 = vmatpush3.msra.mxu1 %v1704_v2 }
 0x1c7   :  { %1418 = vmatprep.subr.mxu1 %v1648_v0 }
 0x1c8   :  { %1419 = vmatpush3.msra.mxu1 %v1713_v3 }
 0x1c9   :  { %1420 = vmatprep.subr.mxu1 %v1648_v0 }
 0x1ca   :  { %1421 = vmatpush3.msra.mxu1 %v1726_v6 }
 0x1cb   :  { %1422 = vmatprep.subr.mxu1 %v1648_v0 }
 0x1cc   :  { %1423 = vmatpush3.msra.mxu1 %v1736_v8 }
 0x1cd   :  { %1424 = vmatprep.subr.mxu1 %v1648_v0 }
 0x1ce   :  { %1425 = vmatpush3.msra.mxu1 %v1746_v10 }
 0x1cf   :  { %1426 = vmatprep.subr.mxu1 %v1648_v0 }
 0x1d0   :  { %1427 = vmatpush3.msra.mxu1 %v1756_v12 }
 0x1d1   :  { %1428 = vmatprep.subr.mxu1 %v1648_v0 }
 0x1d2   :  { %1429 = vmatpush3.msra.mxu1 %v1766_v14 }
 0x1d3   :  { %1430 = vmatprep.subr.mxu1 %v1648_v0 }
 0x1d4   :  { %1431 = vmatpush3.msra.mxu1 %v1775_v15 }
 0x1d5   :  { %1432 = vmatprep.subr.mxu1 %v1648_v0 }
 0x1d6   :  { %1433 = vmatpush3.msra.mxu1 %v1784_v16 }
 0x1d7   :  { %1434 = vmatprep.subr.mxu1 %v1648_v0 }
 0x1d8   :  { %1435 = vmatpush3.msra.mxu1 %v1793_v17 }
 0x1d9   :  { %1436 = vmatprep.subr.mxu1 %v1648_v0 }
 0x1da   :  { %1437 = vmatpush3.msra.mxu1 %v1802_v18 }
 0x1db   :  { %1438 = vmatprep.subr.mxu1 %v1648_v0 }
 0x1dc   :  { %1439 = vmatpush3.msra.mxu1 %v1811_v19 }
 0x1dd   :  { %1440 = vmatprep.subr.mxu1 %v1648_v0 }
 0x1de   :  { %1441 = vmatpush3.msra.mxu1 %v1820_v20 }
 0x1df   :  { %1442 = vmatprep.subr.mxu1 %v1648_v0 }
 0x1e0   :  { %1443 = vmatpush3.msra.mxu1 %v1829_v21 }
 0x1e1   :  { %1444 = vmatprep.subr.mxu1 %v1648_v0 }
 0x1e2   :  { %1445 = vmatpush3.msra.mxu1 %v1838_v22 }
 0x1e3   :  { %1484 = vmatprep.subr.mxu1 %v1648_v0 }
 0x283   :  { %v426_v50 = vpop.f32.mrf.mxu1 }
 0x284   :  { %v430_v51 = vadd.f32 %v426_v50, %v155_v49 }
 0x285   :  { %v1378_v52 = vpop.f32.mrf.mxu1 }
 0x286   :  { %1604 = vtanh.f32 %v430_v51 }
 0x293   :  { %v2016_v53 = vpop.eup %1604 }
 0x294   :  { %1412 = vmatmul.mubr.f32.vlgmr.msra.gmra.mxu0 %v2016_v53 }
 0x295   :  { %1450 = vmatpush3.msra.mxu0 %v1699_v1  ;;  %1481 = vmatprep.mubr.msk.f32.mxu0 %vm1649_vm0, %v1648_v0 }
 0x296   :  { %1451 = vmatprep.subr.mxu0 %v1648_v0 }
 0x297   :  { %1452 = vmatpush3.msra.mxu0 %v1704_v2 }
 0x298   :  { %1453 = vmatprep.subr.mxu0 %v1648_v0 }
 0x299   :  { %1454 = vmatpush3.msra.mxu0 %v1713_v3 }
 0x29a   :  { %1455 = vmatprep.subr.mxu0 %v1648_v0 }
 0x29b   :  { %1456 = vmatpush3.msra.mxu0 %v1726_v6 }
 0x29c   :  { %1457 = vmatprep.subr.mxu0 %v1648_v0 }
 0x29d   :  { %1458 = vmatpush3.msra.mxu0 %v1736_v8 }
 0x29e   :  { %1459 = vmatprep.subr.mxu0 %v1648_v0 }
 0x29f   :  { %1460 = vmatpush3.msra.mxu0 %v1746_v10 }
 0x2a0   :  { %1461 = vmatprep.subr.mxu0 %v1648_v0 }
 0x2a1   :  { %1462 = vmatpush3.msra.mxu0 %v1756_v12 }
 0x2a2   :  { %1463 = vmatprep.subr.mxu0 %v1648_v0 }
 0x2a3   :  { %1464 = vmatpush3.msra.mxu0 %v1766_v14 }
 0x2a4   :  { %1465 = vmatprep.subr.mxu0 %v1648_v0 }
 0x2a5   :  { %1466 = vmatpush3.msra.mxu0 %v1775_v15 }
 0x2a6   :  { %1467 = vmatprep.subr.mxu0 %v1648_v0 }
 0x2a7   :  { %1468 = vmatpush3.msra.mxu0 %v1784_v16 }
 0x2a8   :  { %1469 = vmatprep.subr.mxu0 %v1648_v0 }
 0x2a9   :  { %1470 = vmatpush3.msra.mxu0 %v1793_v17 }
 0x2aa   :  { %1471 = vmatprep.subr.mxu0 %v1648_v0 }
 0x2ab   :  { %1472 = vmatpush3.msra.mxu0 %v1802_v18 }
 0x2ac   :  { %1473 = vmatprep.subr.mxu0 %v1648_v0 }
 0x2ad   :  { %1474 = vmatpush3.msra.mxu0 %v1811_v19 }
 0x2ae   :  { %1475 = vmatprep.subr.mxu0 %v1648_v0 }
 0x2af   :  { %1476 = vmatpush3.msra.mxu0 %v1820_v20 }
 0x2b0   :  { %1477 = vmatprep.subr.mxu0 %v1648_v0 }
 0x2b1   :  { %1478 = vmatpush3.msra.mxu0 %v1829_v21 }
 0x2b2   :  { %1479 = vmatprep.subr.mxu0 %v1648_v0 }
 0x2b3   :  { %1480 = vmatpush3.msra.mxu0 %v1838_v22 }
 0x2b4   :  { %1519 = vmatprep.subr.mxu0 %v1648_v0 }
 0x354   :  { %v502_v55 = vpop.f32.mrf.mxu0 }
 0x355   :  { %v506_v56 = vadd.f32 %v502_v55, %v160_v54 }
 0x356   :  { %v1413_v57 = vpop.f32.mrf.mxu0 }
 0x357   :  { %1606 = vtanh.f32 %v506_v56 }
 0x364   :  { %v2054_v58 = vpop.eup %1606 }
 0x365   :  { %1447 = vmatmul.mubr.f32.vlgmr.msra.gmra.mxu1 %v2054_v58 }
 0x366   :  { %1485 = vmatpush3.msra.mxu1 %v1699_v1  ;;  %1516 = vmatprep.mubr.msk.f32.mxu1 %vm1649_vm0, %v1648_v0 }
 0x367   :  { %1486 = vmatprep.subr.mxu1 %v1648_v0 }
 0x368   :  { %1487 = vmatpush3.msra.mxu1 %v1704_v2 }
 0x369   :  { %1488 = vmatprep.subr.mxu1 %v1648_v0 }
 0x36a   :  { %1489 = vmatpush3.msra.mxu1 %v1713_v3 }
 0x36b   :  { %1490 = vmatprep.subr.mxu1 %v1648_v0 }
 0x36c   :  { %1491 = vmatpush3.msra.mxu1 %v1726_v6 }
 0x36d   :  { %1492 = vmatprep.subr.mxu1 %v1648_v0 }
 0x36e   :  { %1493 = vmatpush3.msra.mxu1 %v1736_v8 }
 0x36f   :  { %1494 = vmatprep.subr.mxu1 %v1648_v0 }
 0x370   :  { %1495 = vmatpush3.msra.mxu1 %v1746_v10 }
 0x371   :  { %1496 = vmatprep.subr.mxu1 %v1648_v0 }
 0x372   :  { %1497 = vmatpush3.msra.mxu1 %v1756_v12 }
 0x373   :  { %1498 = vmatprep.subr.mxu1 %v1648_v0 }
 0x374   :  { %1499 = vmatpush3.msra.mxu1 %v1766_v14 }
 0x375   :  { %1500 = vmatprep.subr.mxu1 %v1648_v0 }
 0x376   :  { %1501 = vmatpush3.msra.mxu1 %v1775_v15 }
 0x377   :  { %1502 = vmatprep.subr.mxu1 %v1648_v0 }
 0x378   :  { %1503 = vmatpush3.msra.mxu1 %v1784_v16 }
 0x379   :  { %1504 = vmatprep.subr.mxu1 %v1648_v0 }
 0x37a   :  { %1505 = vmatpush3.msra.mxu1 %v1793_v17 }
 0x37b   :  { %1506 = vmatprep.subr.mxu1 %v1648_v0 }
 0x37c   :  { %1507 = vmatpush3.msra.mxu1 %v1802_v18 }
 0x37d   :  { %1508 = vmatprep.subr.mxu1 %v1648_v0 }
 0x37e   :  { %1509 = vmatpush3.msra.mxu1 %v1811_v19 }
 0x37f   :  { %1510 = vmatprep.subr.mxu1 %v1648_v0 }
 0x380   :  { %1511 = vmatpush3.msra.mxu1 %v1820_v20 }
 0x381   :  { %1512 = vmatprep.subr.mxu1 %v1648_v0 }
 0x382   :  { %1513 = vmatpush3.msra.mxu1 %v1829_v21 }
 0x383   :  { %1514 = vmatprep.subr.mxu1 %v1648_v0 }
 0x384   :  { %1515 = vmatpush3.msra.mxu1 %v1838_v22 }
 0x425   :  { %v578_v60 = vpop.f32.mrf.mxu1 }
 0x426   :  { %v582_v61 = vadd.f32 %v578_v60, %v165_v59 }
 0x427   :  { %v1448_v62 = vpop.f32.mrf.mxu1 }
 0x428   :  { %1608 = vtanh.f32 %v582_v61 }
 0x435   :  { %v2092_v63 = vpop.eup %1608 }
 0x436   :  { %1482 = vmatmul.mubr.f32.vlgmr.msra.gmra.mxu0 %v2092_v63 }
 0x437   :  { %1520 = vmatpush3.msra.mxu0 %v1699_v1  ;;  %1551 = vmatprep.mubr.msk.f32.mxu0 %vm1649_vm0, %v1648_v0  ;;  %v837_v1 = vld [vmem:[%s2270_s5 + $0x78] sm:$0xff] }
 0x438   :  { %1521 = vmatprep.subr.mxu0 %v1648_v0  ;;  %1554 = vmatprep.subr.mxu1 %v837_v1 }
 0x439   :  { %1522 = vmatpush3.msra.mxu0 %v1704_v2  ;;  %v170_v2 = vadd.f32 %v2007_v45, %v1903_v25 }
 0x43a   :  { %1523 = vmatprep.subr.mxu0 %v1648_v0 }
 0x43b   :  { %1524 = vmatpush3.msra.mxu0 %v1713_v3 }
 0x43c   :  { %1525 = vmatprep.subr.mxu0 %v1648_v0 }
 0x43d   :  { %1526 = vmatpush3.msra.mxu0 %v1726_v6 }
 0x43e   :  { %1527 = vmatprep.subr.mxu0 %v1648_v0 }
 0x43f   :  { %1528 = vmatpush3.msra.mxu0 %v1736_v8  ;;  %v834_v8 = vld [vmem:[%s2270_s5 + $0x60] sm:$0xff] }
 0x440   :  { %1529 = vmatprep.subr.mxu0 %v1648_v0 }
 0x441   :  { %1530 = vmatpush3.msra.mxu0 %v1746_v10  ;;  %v832_v10 = vld [vmem:[%s2270_s5 + $0x50] sm:$0xff] }
 0x442   :  { %1531 = vmatprep.subr.mxu0 %v1648_v0 }
 0x443   :  { %1532 = vmatpush3.msra.mxu0 %v1756_v12  ;;  %v830_v12 = vld [vmem:[%s2270_s5 + $0x40] sm:$0xff] }
 0x444   :  { %1533 = vmatprep.subr.mxu0 %v1648_v0 }
 0x445   :  { %1534 = vmatpush3.msra.mxu0 %v1766_v14  ;;  %v828_v14 = vld [vmem:[%s2270_s5 + $0x30] sm:$0xff] }
 0x446   :  { %1535 = vmatprep.subr.mxu0 %v1648_v0 }
 0x447   :  { %1536 = vmatpush3.msra.mxu0 %v1775_v15  ;;  %v827_v15 = vld [vmem:[%s2270_s5 + $0x28] sm:$0xff] }
 0x448   :  { %1537 = vmatprep.subr.mxu0 %v1648_v0 }
 0x449   :  { %1538 = vmatpush3.msra.mxu0 %v1784_v16  ;;  %v826_v16 = vld [vmem:[%s2270_s5 + $0x20] sm:$0xff] }
 0x44a   :  { %1539 = vmatprep.subr.mxu0 %v1648_v0 }
 0x44b   :  { %1540 = vmatpush3.msra.mxu0 %v1793_v17  ;;  %v825_v17 = vld [vmem:[%s2270_s5 + $0x18] sm:$0xff] }
 0x44c   :  { %1541 = vmatprep.subr.mxu0 %v1648_v0 }
 0x44d   :  { %1542 = vmatpush3.msra.mxu0 %v1802_v18  ;;  %v824_v18 = vld [vmem:[%s2270_s5 + $0x10] sm:$0xff] }
 0x44e   :  { %1543 = vmatprep.subr.mxu0 %v1648_v0 }
 0x44f   :  { %1544 = vmatpush3.msra.mxu0 %v1811_v19  ;;  %v823_v19 = vld [vmem:[%s2270_s5 + $0x8] sm:$0xff] }
 0x450   :  { %1545 = vmatprep.subr.mxu0 %v1648_v0 }
 0x451   :  { %1546 = vmatpush3.msra.mxu0 %v1820_v20  ;;  %v822_v20 = vld [vmem:[%s2270_s5] sm:$0xff] }
 0x452   :  { %1547 = vmatprep.subr.mxu0 %v1648_v0 }
 0x453   :  { %1548 = vmatpush3.msra.mxu0 %v1829_v21  ;;  %v175_v21 = vadd.f32 %v1903_v25, %v2013_v48 }
 0x454   :  { %1549 = vmatprep.subr.mxu0 %v1648_v0  ;;  %v835_v0 = vld [vmem:[%s2270_s5 + $0x68] sm:$0xff] }
 0x455   :  { %1550 = vmatpush3.msra.mxu0 %v1838_v22 }
 0x4f6   :  { %v654_v3 = vpop.f32.mrf.mxu0 }
 0x4f7   :  { %v658_v4 = vadd.f32 %v654_v3, %v170_v2 }
 0x4f8   :  { %v1483_v5 = vpop.f32.mrf.mxu0 }
 0x4f9   :  { %1610 = vtanh.f32 %v658_v4 }
 0x506   :  { %v1611_v6 = vpop.eup %1610 }
 0x507   :  { %1517 = vmatmul.mubr.f32.vlgmr.msra.gmra.mxu1 %v1611_v6 }
 0x508   :  { %1555 = vmatpush3.msra.mxu1 %v837_v1  ;;  %1586 = vmatprep.mubr.f32.mxu1 %v1906_v31 }
 0x509   :  { %1556 = vmatprep.subr.mxu1 %v836_v7 }
 0x50a   :  { %1557 = vmatpush3.msra.mxu1 %v836_v7 }
 0x50b   :  { %1558 = vmatprep.subr.mxu1 %v835_v0 }
 0x50c   :  { %1559 = vmatpush3.msra.mxu1 %v835_v0 }
 0x50d   :  { %1560 = vmatprep.subr.mxu1 %v834_v8 }
 0x50e   :  { %1561 = vmatpush3.msra.mxu1 %v834_v8 }
 0x50f   :  { %1562 = vmatprep.subr.mxu1 %v833_v9 }
 0x510   :  { %1563 = vmatpush3.msra.mxu1 %v833_v9 }
 0x511   :  { %1564 = vmatprep.subr.mxu1 %v832_v10 }
 0x512   :  { %1565 = vmatpush3.msra.mxu1 %v832_v10 }
 0x513   :  { %1566 = vmatprep.subr.mxu1 %v831_v11 }
 0x514   :  { %1567 = vmatpush3.msra.mxu1 %v831_v11 }
 0x515   :  { %1568 = vmatprep.subr.mxu1 %v830_v12 }
 0x516   :  { %1569 = vmatpush3.msra.mxu1 %v830_v12 }
 0x517   :  { %1570 = vmatprep.subr.mxu1 %v829_v13 }
 0x518   :  { %1571 = vmatpush3.msra.mxu1 %v829_v13 }
 0x519   :  { %1572 = vmatprep.subr.mxu1 %v828_v14 }
 0x51a   :  { %1573 = vmatpush3.msra.mxu1 %v828_v14 }
 0x51b   :  { %1574 = vmatprep.subr.mxu1 %v827_v15 }
 0x51c   :  { %1575 = vmatpush3.msra.mxu1 %v827_v15 }
 0x51d   :  { %1576 = vmatprep.subr.mxu1 %v826_v16 }
 0x51e   :  { %1577 = vmatpush3.msra.mxu1 %v826_v16 }
 0x51f   :  { %1578 = vmatprep.subr.mxu1 %v825_v17 }
 0x520   :  { %1579 = vmatpush3.msra.mxu1 %v825_v17 }
 0x521   :  { %1580 = vmatprep.subr.mxu1 %v824_v18 }
 0x522   :  { %1581 = vmatpush3.msra.mxu1 %v824_v18 }
 0x523   :  { %1582 = vmatprep.subr.mxu1 %v823_v19 }
 0x524   :  { %1583 = vmatpush3.msra.mxu1 %v823_v19 }
 0x525   :  { %1584 = vmatprep.subr.mxu1 %v822_v20 }
 0x526   :  { %1585 = vmatpush3.msra.mxu1 %v822_v20 }
 0x527   :  { %1587 = vmatmul.mubr.f32.vlgmr.msra.gmra.mxu1 %v1970_v42 }
 0x528   :  { %1589 = vmatprep.mubr.f32.mxu1 %v2016_v53 }
 0x52b   :  { %1590 = vmatmul.mubr.f32.gmra.mxu1 %v2054_v58 }
 0x52c   :  { %1592 = vmatprep.mubr.f32.mxu1 %v2092_v63 }
 0x52f   :  { %1593 = vmatmul.mubr.f32.gmra.mxu1 %v1611_v6 }
 0x5c7   :  { %v730_v22 = vpop.f32.mrf.mxu1 }
 0x5c8   :  { %v734_v23 = vadd.f32 %v730_v22, %v175_v21 }
 0x5c9   :  { %v1518_v24 = vpop.f32.mrf.mxu1 }
 0x5ca   :  { %1612 = vtanh.f32 %v734_v23 }
 0x5d7   :  { %v1613_v26 = vpop.eup %1612 }
 0x5d8   :  { %1552 = vmatmul.mubr.f32.vlgmr.msra.gmra.mxu0 %v1613_v26  ;;  %1595 = vmatprep.mubr.f32.mxu1 %v1613_v26 }
 0x5e7   :  { %v1588_v28 = vpop.f32.mrf.mxu1 }
 0x5e8   :  { %v925_v29 = vadd.f32 %v1588_v28, %v1081_v27 }
 0x5e9   :  { %v919_v30 = vpop.f32.mrf.mxu1 }
 0x5ea   :  { %v920_v31 = vadd.f32 %v1081_v27, %v919_v30  ;;  %v961_v32 = vsel %vm53_vm1, %v925_v29, -inf }
 0x5eb   :  { %962 = vmax.xlane.f32.xlu0 %v961_v32  ;;  %v1591_v33 = vpop.f32.mrf.mxu1 }
 0x5ec   :  { %v935_v34 = vadd.f32 %v1591_v33, %v1081_v27  ;;  %v958_v38 = vsel %vm53_vm1, %v920_v31, -inf }
 0x5ed   :  { %v929_v35 = vpop.f32.mrf.mxu1 }
 0x5ee   :  { %v930_v36 = vadd.f32 %v1081_v27, %v929_v35  ;;  %v967_v37 = vsel %vm53_vm1, %v935_v34, -inf }
 0x5ef   :  { %968 = vmax.xlane.f32.xlu1 %v967_v37  ;;  %v1594_v39 = vpop.f32.mrf.mxu1  ;;  %959 = vmax.xlane.f32.xlu0 %v958_v38 }
 0x5f0   :  { %v945_v41 = vadd.f32 %v1594_v39, %v1081_v27  ;;  %v964_v43 = vsel %vm53_vm1, %v930_v36, -inf }
 0x5f1   :  { %v939_v40 = vpop.f32.mrf.mxu1 }
 0x5f2   :  { %v940_v42 = vadd.f32 %v1081_v27, %v939_v40  ;;  %v973_v45 = vsel %vm53_vm1, %v945_v41, -inf }
 0x5f3   :  { %965 = vmax.xlane.f32.xlu1 %v964_v43 }
 0x5f4   :  { %v970_v44 = vsel %vm53_vm1, %v940_v42, -inf }
 0x5f5   :  { %971 = vmax.xlane.f32.xlu0 %v970_v44 }
 0x5f7   :  { %974 = vmax.xlane.f32.xlu1 %v973_v45 }
 0x674   :  { %v963_v52 = vpop.xlane.xlu0 %962 }
 0x675   :  { %v2199_v56 = vsub.f32 %v925_v29, %v963_v52 }
 0x677   :  { %v992_v25 = vmul.f32 1.442695, %v2199_v56 }
 0x678   :  { %v969_v53 = vpop.xlane.xlu1 %968  ;;  %v960_v54 = vpop.xlane.xlu0 %959 }
 0x679   :  { %v2201_v57 = vsub.f32 %v920_v31, %v960_v54  ;;  %v2204_v47 = vsub.f32 %v935_v34, %v969_v53 }
 0x67b   :  { %v990_v59 = vmul.f32 1.442695, %v2201_v57  ;;  %v996_v62 = vmul.f32 1.442695, %v2204_v47 }
 0x67c   :  { %v966_v55 = vpop.xlane.xlu1 %965 }
 0x67d   :  { %v2207_v60 = vsub.f32 %v930_v36, %v966_v55 }
 0x67e   :  { %v972_v61 = vpop.xlane.xlu0 %971 }
 0x67f   :  { %v994_v1 = vmul.f32 1.442695, %v2207_v60  ;;  %v2213_v2 = vsub.f32 %v940_v42, %v972_v61 }
 0x680   :  { %v975_v58 = vpop.xlane.xlu1 %974 }
 0x681   :  { %v2210_v63 = vsub.f32 %v945_v41, %v975_v58  ;;  %v998_v4 = vmul.f32 1.442695, %v2213_v2 }
 0x683   :  { %v1000_v3 = vmul.f32 1.442695, %v2210_v63 }
 0x698   :  { %v806_v48 = vpop.f32.mrf.mxu0 }
 0x699   :  { %v810_v49 = vadd.f32 %v806_v48, %v180_v46 }
 0x69a   :  { %v1553_v50 = vpop.f32.mrf.mxu0 }
 0x69b   :  { %1614 = vtanh.f32 %v810_v49 }
 0x69c   :  { %1616 = vpow2.f32 %v992_v25 }
 0x69d   :  { %1618 = vpow2.f32 %v990_v59 }
 0x69e   :  { %1620 = vpow2.f32 %v996_v62 }
 0x69f   :  { %1622 = vpow2.f32 %v994_v1 }
 0x6a0   :  { %1624 = vpow2.f32 %v1000_v3 }
 0x6a1   :  { %1626 = vpow2.f32 %v998_v4 }
 0x6a8   :  { %v1615_v51 = vpop.eup %1614 }
 0x6a9   :  { %821 = vst [vmem:[%s2272_s8] sm:$0xff] %v1615_v51  ;;  %1596 = vmatmul.mubr.f32.gmra.mxu1 %v1615_v51  ;;  %v1617_v9 = vpop.eup %1616 }
 0x6aa   :  { %v1619_v11 = vpop.eup %1618  ;;  %v1009_v12 = vsel %vm53_vm1, %v1617_v9, 0.0 }
 0x6ab   :  { %v1621_v13 = vpop.eup %1620  ;;  %v1006_v14 = vsel %vm53_vm1, %v1619_v11, 0.0 }
 0x6ac   :  { %v1623_v15 = vpop.eup %1622  ;;  %v1015_v16 = vsel %vm53_vm1, %v1621_v13, 0.0 }
 0x6ad   :  { %v1625_v17 = vpop.eup %1624  ;;  %v1012_v18 = vsel %vm53_vm1, %v1623_v15, 0.0 }
 0x6ae   :  { %v1627_v19 = vpop.eup %1626  ;;  %v1021_v20 = vsel %vm53_vm1, %v1625_v17, 0.0 }
 0x6af   :  { %v1018_v21 = vsel %vm53_vm1, %v1627_v19, 0.0 }
 0x769   :  { %v1597_v5 = vpop.f32.mrf.mxu1 }
 0x76a   :  { %v955_v6 = vadd.f32 %v1597_v5, %v1081_v27 }
 0x76b   :  { %v949_v7 = vpop.f32.mrf.mxu1 }
 0x76c   :  { %v950_v0 = vadd.f32 %v1081_v27, %v949_v7  ;;  %v979_v8 = vsel %vm53_vm1, %v955_v6, -inf }
 0x76d   :  { %980 = vmax.xlane.f32.xlu1 %v979_v8 }
 0x76e   :  { %v976_v10 = vsel %vm53_vm1, %v950_v0, -inf }
 0x76f   :  { %977 = vmax.xlane.f32.xlu0 %v976_v10 }
 0x771   :  { %1010 = vadd.xlane.f32.xlu1 %v1009_v12 }
 0x773   :  { %1007 = vadd.xlane.f32.xlu0 %v1006_v14 }
 0x775   :  { %1016 = vadd.xlane.f32.xlu1 %v1015_v16 }
 0x777   :  { %1013 = vadd.xlane.f32.xlu0 %v1012_v18 }
 0x779   :  { %1022 = vadd.xlane.f32.xlu1 %v1021_v20 }
 0x77b   :  { %1019 = vadd.xlane.f32.xlu0 %v1018_v21 }
 0x7f6   :  { %v981_v22 = vpop.xlane.xlu1 %980 }
 0x7f7   :  { %v989_v23 = vsub.f32 %v955_v6, %v981_v22 }
 0x7f8   :  { %v978_v24 = vpop.xlane.xlu0 %977 }
 0x7f9   :  { %v1004_v26 = vmul.f32 1.442695, %v989_v23  ;;  %v988_v27 = vsub.f32 %v950_v0, %v978_v24 }
 0x7fa   :  { %v1011_v28 = vpop.xlane.xlu1 %1010 }
 0x7fb   :  { %1628 = vpow2.f32 %v1004_v26  ;;  %v1002_v29 = vmul.f32 1.442695, %v988_v27 }
 0x7fc   :  { %1630 = vlog2.f32 %v1011_v28  ;;  %v1008_v30 = vpop.xlane.xlu0 %1007 }
 0x7fd   :  { %1632 = vpow2.f32 %v1002_v29 }
 0x7fe   :  { %1634 = vlog2.f32 %v1008_v30  ;;  %v1017_v31 = vpop.xlane.xlu1 %1016 }
 0x7ff   :  { %1636 = vlog2.f32 %v1017_v31 }
 0x800   :  { %v1014_v32 = vpop.xlane.xlu0 %1013 }
 0x801   :  { %1638 = vlog2.f32 %v1014_v32 }
 0x802   :  { %v1023_v33 = vpop.xlane.xlu1 %1022 }
 0x803   :  { %1640 = vlog2.f32 %v1023_v33 }
 0x804   :  { %v1020_v34 = vpop.xlane.xlu0 %1019 }
 0x805   :  { %1642 = vlog2.f32 %v1020_v34 }
 0x808   :  { %v1629_v35 = vpop.eup %1628 }
 0x809   :  { %v1631_v36 = vpop.eup %1630  ;;  %v1027_v37 = vsel %vm53_vm1, %v1629_v35, 0.0 }
 0x80a   :  { %v1633_v38 = vpop.eup %1632  ;;  %v1033_v39 = vmul.f32 0.6931472, %v1631_v36  ;;  %1028 = vadd.xlane.f32.xlu1 %v1027_v37 }
 0x80b   :  { %v1635_v40 = vpop.eup %1634  ;;  %v1024_v41 = vsel %vm53_vm1, %v1633_v38, 0.0 }
 0x80c   :  { %v1637_v42 = vpop.eup %1636  ;;  %v1047_v43 = vsub.f32 %v2199_v56, %v1033_v39  ;;  %v1031_v44 = vmul.f32 0.6931472, %v1635_v40  ;;  %1025 = vadd.xlane.f32.xlu0 %v1024_v41 }
 0x80d   :  { %v1037_v45 = vmul.f32 0.6931472, %v1637_v42 }
 0x80e   :  { %v1639_v46 = vpop.eup %1638  ;;  %1055 = vst.msk [vmem:[%s2273_s7 + $0x8] sm:$0xff] %vm53_vm1, %v1047_v43  ;;  %v1046_v48 = vsub.f32 %v2201_v57, %v1031_v44 }
 0x80f   :  { %v1049_v49 = vsub.f32 %v2204_v47, %v1037_v45  ;;  %v1035_v50 = vmul.f32 0.6931472, %v1639_v46 }
 0x810   :  { %v1641_v51 = vpop.eup %1640  ;;  %1054 = vst.msk [vmem:[%s2273_s7] sm:$0xff] %vm53_vm1, %v1046_v48 }
 0x811   :  { %1057 = vst.msk [vmem:[%s2273_s7 + $0x18] sm:$0xff] %vm53_vm1, %v1049_v49  ;;  %v1048_v52 = vsub.f32 %v2207_v60, %v1035_v50  ;;  %v1041_v53 = vmul.f32 0.6931472, %v1641_v51 }
 0x812   :  { %v1643_v54 = vpop.eup %1642 }
 0x813   :  { %1056 = vst.msk [vmem:[%s2273_s7 + $0x10] sm:$0xff] %vm53_vm1, %v1048_v52  ;;  %v1051_v55 = vsub.f32 %v2210_v63, %v1041_v53  ;;  %v1039_v56 = vmul.f32 0.6931472, %v1643_v54 }
 0x815   :  { %1059 = vst.msk [vmem:[%s2273_s7 + $0x28] sm:$0xff] %vm53_vm1, %v1051_v55  ;;  %v1050_v57 = vsub.f32 %v2213_v2, %v1039_v56 }
 0x817   :  { %1058 = vst.msk [vmem:[%s2273_s7 + $0x20] sm:$0xff] %vm53_vm1, %v1050_v57 }
 0x893   :  { %v1029_v25 = vpop.xlane.xlu1 %1028 }
 0x894   :  { %1644 = vlog2.f32 %v1029_v25 }
 0x895   :  { %v1026_v47 = vpop.xlane.xlu0 %1025 }
 0x896   :  { %1646 = vlog2.f32 %v1026_v47 }
 0x8a1   :  { %v1645_v58 = vpop.eup %1644 }
 0x8a2   :  { %v1045_v59 = vmul.f32 0.6931472, %v1645_v58 }
 0x8a3   :  { %v1647_v60 = vpop.eup %1646 }
 0x8a4   :  { %v1053_v61 = vsub.f32 %v989_v23, %v1045_v59  ;;  %v1043_v62 = vmul.f32 0.6931472, %v1647_v60 }
 0x8a6   :  { %1061 = vst.msk [vmem:[%s2273_s7 + $0x38] sm:$0xff] %vm53_vm1, %v1053_v61  ;;  %v1052_v63 = vsub.f32 %v988_v27, %v1043_v62 }
 0x8a8   :  { %1060 = vst.msk [vmem:[%s2273_s7 + $0x30] sm:$0xff] %vm53_vm1, %v1052_v63 }

</bundles_post_ra>
